<compile_context>
chip_gen: v5e
topology: v5e:2x2
jax: 0.10.0
libtpu: 0.0.40
codegen_flags: <defaults>
</compile_context>

<pallas_src>
import functools
import math

import jax
import jax.numpy as jnp
from jax import lax
from jax.experimental import pallas as pl
from jax.experimental.pallas import tpu as pltpu


# ----------------------------- Pallas kernel ------------------------------- #

def _fused_attention_kernel(x1_ref, x2_ref, w_ref, b_ref, o_ref,
                            *, depth, groups, s1, s2, inv_scale):
    """Per-batch fused QKV projection + attention + output projection.

    x1_ref: (1, G, S1, D) f32     x2_ref: (1, G, S2, D) f32
    w_ref : (D, 4D) bf16  -- [wq.T | wk.T | wv.T | wo.T]
    b_ref : (1, 4D) f32   -- [bq   | bk   | bv   | bo  ]
    o_ref : (1, S1, G*D) f32   (lane-dense; reshaped to (B, S1, G, D) outside)
    """
    D = depth
    G = groups

    # Hoisted weight/bias views (static lane slices at 128-multiples).
    w_q = w_ref[:, 0:D]            # (D, D)   bf16
    w_kv = w_ref[:, D:3 * D]       # (D, 2D)  bf16 -> one 256-wide MXU matmul
    w_o = w_ref[:, 3 * D:4 * D]    # (D, D)   bf16
    b_q = b_ref[:, 0:D]            # (1, D)   f32
    b_kv = b_ref[:, D:3 * D]       # (1, 2D)  f32
    b_o = b_ref[:, 3 * D:4 * D]    # (1, D)   f32

    # Flatten groups into the matmul M dimension so the projections fill the MXU
    # (M = G*S1 / G*S2 rows instead of S1 / S2 per-group).
    x1 = x1_ref[...].reshape(G * s1, D).astype(jnp.bfloat16)
    x2 = x2_ref[...].reshape(G * s2, D).astype(jnp.bfloat16)

    q = jnp.dot(x1, w_q, preferred_element_type=jnp.float32) + b_q       # (G*S1, D)  f32
    kv = jnp.dot(x2, w_kv, preferred_element_type=jnp.float32) + b_kv    # (G*S2, 2D) f32

    attn_blocks = []
    for g in range(G):                          # static unroll; G is small
        q_g = q[g * s1:(g + 1) * s1].astype(jnp.bfloat16)          # (S1, D)
        k_g = kv[g * s2:(g + 1) * s2, 0:D].astype(jnp.bfloat16)    # (S2, D)
        v_g = kv[g * s2:(g + 1) * s2, D:2 * D].astype(jnp.bfloat16)

        # q @ k^T without materializing a transpose of k (transposed-RHS MXU path).
        s = lax.dot_general(q_g, k_g, (((1,), (1,)), ((), ())),
                            preferred_element_type=jnp.float32)     # (S1, S2) f32
        if inv_scale != 1.0:        # compile-time check; dead op when scale == 1
            s = s * inv_scale

        # Softmax statistics stay in f32; only MXU operands are bf16.
        m = jnp.max(s, axis=-1, keepdims=True)
        e = jnp.exp(s - m)
        denom = jnp.sum(e, axis=-1, keepdims=True)                  # (S1, 1)
        inv_denom = pl.reciprocal(denom, approx=True)               # EUP slot

        if s2 <= D:
            # Normalize the smaller (S1, S2) score tile, then do the PV matmul.
            p = (e * inv_denom).astype(jnp.bfloat16)
            attn_blocks.append(jnp.dot(p, v_g,
                                       preferred_element_type=jnp.float32))
        else:
            # Deferred normalization: the (S1, D) PV output is the smaller side.
            o_un = jnp.dot(e.astype(jnp.bfloat16), v_g,
                           preferred_element_type=jnp.float32)
            attn_blocks.append(o_un * inv_denom)

    attn = attn_blocks[0] if G == 1 else jnp.concatenate(attn_blocks, axis=0)

    # Single fused wo projection over all group rows.
    out = jnp.dot(attn.astype(jnp.bfloat16), w_o,
                  preferred_element_type=jnp.float32) + b_o          # (G*S1, D) f32

    # Lane-dense store; this layout *is* the reference transpose(1, 2).
    for g in range(G):
        o_ref[0, :, g * D:(g + 1) * D] = out[g * s1:(g + 1) * s1].astype(o_ref.dtype)


# ------------------------------ wrapper ------------------------------------ #

def self_attention_forward(x1, x2, w_all, b_all, *, heads, depth):
    B, G, S1, D = x1.shape
    _, _, S2, _ = x2.shape
    assert D == depth
    inv_scale = 1.0 / math.sqrt(depth / heads)

    kernel = functools.partial(_fused_attention_kernel,
                               depth=D, groups=G, s1=S1, s2=S2,
                               inv_scale=inv_scale)

    out_flat = pl.pallas_call(
        kernel,
        out_shape=jax.ShapeDtypeStruct((B, S1, G * D), jnp.float32),
        grid_spec=pltpu.PrefetchScalarGridSpec(
            num_scalar_prefetch=0,
            grid=(B,),
            in_specs=[
                pl.BlockSpec((1, G, S1, D), lambda b: (b, 0, 0, 0)),
                pl.BlockSpec((1, G, S2, D), lambda b: (b, 0, 0, 0)),
                pl.BlockSpec((D, 4 * D), lambda b: (0, 0)),   # bf16 packed weights
                pl.BlockSpec((1, 4 * D), lambda b: (0, 0)),   # f32 packed biases
            ],
            out_specs=pl.BlockSpec((1, S1, G * D), lambda b: (b, 0, 0)),
        ),
        compiler_params=pltpu.CompilerParams(
            dimension_semantics=("parallel",)),
    )(x1, x2, w_all, b_all)

    # Free trailing-dim reshape: (B, S1, G*D) -> (B, S1, G, D).
    return out_flat.reshape(B, S1, G, D)


# ----------------------------- module port --------------------------------- #

class SelfAttentionPallas:
    def __init__(self, heads=1, depth=128, *, key):
        self.depth = depth
        self.heads = heads
        ks = jax.random.split(key, 8)
        bound = 1.0 / math.sqrt(depth)   # PyTorch nn.Linear default init range

        def w(k):
            return jax.random.uniform(k, (depth, depth), jnp.float32, -bound, bound)

        def b(k):
            return jax.random.uniform(k, (depth,), jnp.float32, -bound, bound)

        self.wq, self.bq = w(ks[0]), b(ks[1])
        self.wk, self.bk = w(ks[2]), b(ks[3])
        self.wv, self.bv = w(ks[4]), b(ks[5])
        self.wo, self.bo = w(ks[6]), b(ks[7])

        # Pack ONCE at init (not on the forward path): pre-transposed weights in
        # bf16 (halves weight DMA; MXU is native bf16), biases in f32 (added after
        # the f32-accumulated matmuls).
        self.w_all = jnp.concatenate(
            [self.wq.T, self.wk.T, self.wv.T, self.wo.T], axis=1
        ).astype(jnp.bfloat16)                                        # (D, 4D)
        self.b_all = jnp.concatenate(
            [self.bq, self.bk, self.bv, self.bo]).reshape(1, 4 * depth)  # (1, 4D)

    def __call__(self, x1, x2):
        # Whole forward (v1..v12) in one fused Pallas kernel.  The split/cat glue
        # (v7..v11) is an identity + transpose(1,2) for heads == depth and B <= 10,
        # which is folded into the kernel's output layout.
        assert self.heads == self.depth and x1.shape[0] <= 10, (
            "fused path only valid for heads == depth and batch <= 10")
        return self_attention_forward(
            x1, x2, self.w_all, self.b_all,
            heads=self.heads, depth=self.depth)


def _reference(x1, x2, m):
    """Pure-JAX f32 reference of the same forward (heads == depth, B <= 10)."""
    q = x1 @ m.wq.T + m.bq
    k = x2 @ m.wk.T + m.bk
    v = x2 @ m.wv.T + m.bv
    s = jnp.einsum('bgqd,bgkd->bgqk', q, k) / math.sqrt(m.depth / m.heads)
    p = jax.nn.softmax(s, axis=-1)
    o = jnp.einsum('bgqk,bgkd->bgqd', p, v)
    o = jnp.swapaxes(o, 1, 2)            # splits/cats are identities here
    return o @ m.wo.T + m.bo


# --------------------------------- main ------------------------------------ #

if __name__ == "__main__":
    key = jax.random.PRNGKey(0)
    kp, k1, k2 = jax.random.split(key, 3)

    B, G, S1, S2, D = 2, 1, 32, 64, 128   # small, self-consistent shapes
    model = SelfAttentionPallas(heads=D, depth=D, key=kp)

    x1 = jax.random.normal(k1, (B, G, S1, D), jnp.float32)
    x2 = jax.random.normal(k2, (B, G, S2, D), jnp.float32)

    out = model(x1, x2)
    out = jax.block_until_ready(out)
    assert out.shape == (B, S1, G, D), out.shape

    ref = _reference(x1, x2, model)
    # Tolerance relaxed vs the pure-f32 reference: the kernel feeds the MXU bf16
    # operands (f32 accumulation, f32 softmax stats) and normalizes with the EUP
    # approximate reciprocal.
    err = float(jnp.max(jnp.abs(out - ref)))
    assert jnp.allclose(out, ref, rtol=2e-2, atol=2e-2), err

    print("KERNEL_OK")
</pallas_src>

<mosaic_0001>
module attributes {stable_mosaic.version = 11 : i64} {
  func.func @_fused_attention_kernel(%arg0: i32, %arg1: memref<1x1x32x128xf32, #tpu.memory_space<vmem>>, %arg2: memref<1x1x64x128xf32, #tpu.memory_space<vmem>>, %arg3: memref<128x512xbf16, #tpu.memory_space<vmem>>, %arg4: memref<1x512xf32, #tpu.memory_space<vmem>>, %arg5: memref<1x32x128xf32, #tpu.memory_space<vmem>>) attributes {dimension_semantics = [#tpu.dimension_semantics<parallel>], iteration_bounds = array<i64: 2>, scalar_prefetch = 0 : i64, scratch_operands = 0 : i64, tpu.core_type = #tpu.core_type<tc>, window_params = [{transform_indices = @transform_0, window_bounds = array<i64: 1, 1, 32, 128>}, {transform_indices = @transform_1, window_bounds = array<i64: 1, 1, 64, 128>}, {pipeline_mode = #tpu.pipeline_mode<synchronous>, transform_indices = @transform_2, window_bounds = array<i64: 128, 512>}, {pipeline_mode = #tpu.pipeline_mode<synchronous>, transform_indices = @transform_3, window_bounds = array<i64: 1, 512>}, {transform_indices = @transform_4, window_bounds = array<i64: 1, 32, 128>}]} {
    %c0 = arith.constant 0 : index
    %c0_0 = arith.constant 0 : index
    %0 = vector.load %arg3[%c0, %c0_0] : memref<128x512xbf16, #tpu.memory_space<vmem>>, vector<128x128xbf16>
    %c0_1 = arith.constant 0 : index
    %c128 = arith.constant 128 : index
    %1 = vector.load %arg3[%c0_1, %c128] : memref<128x512xbf16, #tpu.memory_space<vmem>>, vector<128x256xbf16>
    %c0_2 = arith.constant 0 : index
    %c384 = arith.constant 384 : index
    %2 = vector.load %arg3[%c0_2, %c384] : memref<128x512xbf16, #tpu.memory_space<vmem>>, vector<128x128xbf16>
    %c0_3 = arith.constant 0 : index
    %c0_4 = arith.constant 0 : index
    %3 = vector.load %arg4[%c0_3, %c0_4] : memref<1x512xf32, #tpu.memory_space<vmem>>, vector<1x128xf32>
    %c0_5 = arith.constant 0 : index
    %c128_6 = arith.constant 128 : index
    %4 = vector.load %arg4[%c0_5, %c128_6] : memref<1x512xf32, #tpu.memory_space<vmem>>, vector<1x256xf32>
    %c0_7 = arith.constant 0 : index
    %c384_8 = arith.constant 384 : index
    %5 = vector.load %arg4[%c0_7, %c384_8] : memref<1x512xf32, #tpu.memory_space<vmem>>, vector<1x128xf32>
    %c0_9 = arith.constant 0 : index
    %c0_10 = arith.constant 0 : index
    %c0_11 = arith.constant 0 : index
    %c0_12 = arith.constant 0 : index
    %6 = vector.load %arg1[%c0_9, %c0_10, %c0_11, %c0_12] : memref<1x1x32x128xf32, #tpu.memory_space<vmem>>, vector<1x1x32x128xf32>
    %7 = vector.shape_cast %6 : vector<1x1x32x128xf32> to vector<32x128xf32>
    %8 = arith.truncf %7 : vector<32x128xf32> to vector<32x128xbf16>
    %c0_13 = arith.constant 0 : index
    %c0_14 = arith.constant 0 : index
    %c0_15 = arith.constant 0 : index
    %c0_16 = arith.constant 0 : index
    %9 = vector.load %arg2[%c0_13, %c0_14, %c0_15, %c0_16] : memref<1x1x64x128xf32, #tpu.memory_space<vmem>>, vector<1x1x64x128xf32>
    %10 = vector.shape_cast %9 : vector<1x1x64x128xf32> to vector<64x128xf32>
    %11 = arith.truncf %10 : vector<64x128xf32> to vector<64x128xbf16>
    %cst = arith.constant dense<0.000000e+00> : vector<32x128xf32>
    %12 = tpu.matmul %8, %0, %cst {dimension_numbers = #tpu.dot_dimension_numbers<[1], [0], [0], [1], [0, 0, 1, 1], [], []>} : vector<32x128xbf16>, vector<128x128xbf16>, vector<32x128xf32> -> vector<32x128xf32>
    %13 = vector.broadcast %3 : vector<1x128xf32> to vector<32x128xf32>
    %14 = arith.addf %12, %13 : vector<32x128xf32>
    %cst_17 = arith.constant dense<0.000000e+00> : vector<64x256xf32>
    %15 = tpu.matmul %11, %1, %cst_17 {dimension_numbers = #tpu.dot_dimension_numbers<[1], [0], [0], [1], [0, 0, 1, 1], [], []>} : vector<64x128xbf16>, vector<128x256xbf16>, vector<64x256xf32> -> vector<64x256xf32>
    %16 = vector.broadcast %4 : vector<1x256xf32> to vector<64x256xf32>
    %17 = arith.addf %15, %16 : vector<64x256xf32>
    %18 = arith.truncf %14 : vector<32x128xf32> to vector<32x128xbf16>
    %19 = vector.extract_strided_slice %17 {offsets = [0, 0], sizes = [64, 128], strides = [1, 1]} : vector<64x256xf32> to vector<64x128xf32>
    %20 = arith.truncf %19 : vector<64x128xf32> to vector<64x128xbf16>
    %21 = vector.extract_strided_slice %17 {offsets = [0, 128], sizes = [64, 128], strides = [1, 1]} : vector<64x256xf32> to vector<64x128xf32>
    %22 = arith.truncf %21 : vector<64x128xf32> to vector<64x128xbf16>
    %cst_18 = arith.constant dense<0.000000e+00> : vector<32x64xf32>
    %23 = tpu.matmul %18, %20, %cst_18 {dimension_numbers = #tpu.dot_dimension_numbers<[1], [1], [0], [0], [0, 0, 1, 0], [], []>} : vector<32x128xbf16>, vector<64x128xbf16>, vector<32x64xf32> -> vector<32x64xf32>
    %cst_19 = arith.constant dense<0xFF800000> : vector<32xf32>
    %24 = vector.multi_reduction <maximumf>, %23, %cst_19 [1] : vector<32x64xf32> to vector<32xf32>
    %25 = vector.shape_cast %24 : vector<32xf32> to vector<32x1xf32>
    %26 = vector.broadcast %25 : vector<32x1xf32> to vector<32x64xf32>
    %27 = arith.subf %23, %26 : vector<32x64xf32>
    %28 = math.exp %27 : vector<32x64xf32>
    %cst_20 = arith.constant dense<0.000000e+00> : vector<32xf32>
    %29 = vector.multi_reduction <add>, %28, %cst_20 [1] : vector<32x64xf32> to vector<32xf32>
    %30 = vector.shape_cast %29 : vector<32xf32> to vector<32x1xf32>
    %31 = tpu.reciprocal %30 {approx = true} : vector<32x1xf32> -> vector<32x1xf32>
    %32 = vector.broadcast %31 : vector<32x1xf32> to vector<32x64xf32>
    %33 = arith.mulf %28, %32 : vector<32x64xf32>
    %34 = arith.truncf %33 : vector<32x64xf32> to vector<32x64xbf16>
    %cst_21 = arith.constant dense<0.000000e+00> : vector<32x128xf32>
    %35 = tpu.matmul %34, %22, %cst_21 {dimension_numbers = #tpu.dot_dimension_numbers<[1], [0], [0], [1], [0, 0, 1, 1], [], []>} : vector<32x64xbf16>, vector<64x128xbf16>, vector<32x128xf32> -> vector<32x128xf32>
    %36 = arith.truncf %35 : vector<32x128xf32> to vector<32x128xbf16>
    %cst_22 = arith.constant dense<0.000000e+00> : vector<32x128xf32>
    %37 = tpu.matmul %36, %2, %cst_22 {dimension_numbers = #tpu.dot_dimension_numbers<[1], [0], [0], [1], [0, 0, 1, 1], [], []>} : vector<32x128xbf16>, vector<128x128xbf16>, vector<32x128xf32> -> vector<32x128xf32>
    %38 = vector.broadcast %5 : vector<1x128xf32> to vector<32x128xf32>
    %39 = arith.addf %37, %38 : vector<32x128xf32>
    %c0_23 = arith.constant 0 : index
    %c0_24 = arith.constant 0 : index
    %c0_25 = arith.constant 0 : index
    %40 = vector.load %arg5[%c0_23, %c0_24, %c0_25] : memref<1x32x128xf32, #tpu.memory_space<vmem>>, vector<1x32x128xf32>
    %41 = vector.shape_cast %40 : vector<1x32x128xf32> to vector<32x128xf32>
    %42 = vector.shape_cast %39 : vector<32x128xf32> to vector<1x32x128xf32>
    tpu.vector_store %arg5[%c0_23, %c0_24, %c0_25], %42 {strides = array<i32>} : memref<1x32x128xf32, #tpu.memory_space<vmem>>, vector<1x32x128xf32>,
    return
  }
  func.func @transform_0(%arg0: i32) -> (i32, i32, i32, i32) {
    %c0_i32 = arith.constant 0 : i32
    %c0_i32_0 = arith.constant 0 : i32
    %c0_i32_1 = arith.constant 0 : i32
    %c0_i32_2 = arith.constant 0 : i32
    return %arg0, %c0_i32, %c0_i32_0, %c0_i32_1 : i32, i32, i32, i32
  }
  func.func @transform_1(%arg0: i32) -> (i32, i32, i32, i32) {
    %c0_i32 = arith.constant 0 : i32
    %c0_i32_0 = arith.constant 0 : i32
    %c0_i32_1 = arith.constant 0 : i32
    %c0_i32_2 = arith.constant 0 : i32
    return %arg0, %c0_i32, %c0_i32_0, %c0_i32_1 : i32, i32, i32, i32
  }
  func.func @transform_2(%arg0: i32) -> (i32, i32) {
    %c0_i32 = arith.constant 0 : i32
    %c0_i32_0 = arith.constant 0 : i32
    %c0_i32_1 = arith.constant 0 : i32
    return %c0_i32, %c0_i32_0 : i32, i32
  }
  func.func @transform_3(%arg0: i32) -> (i32, i32) {
    %c0_i32 = arith.constant 0 : i32
    %c0_i32_0 = arith.constant 0 : i32
    %c0_i32_1 = arith.constant 0 : i32
    return %c0_i32, %c0_i32_0 : i32, i32
  }
  func.func @transform_4(%arg0: i32) -> (i32, i32, i32) {
    %c0_i32 = arith.constant 0 : i32
    %c0_i32_0 = arith.constant 0 : i32
    %c0_i32_1 = arith.constant 0 : i32
    return %arg0, %c0_i32, %c0_i32_0 : i32, i32, i32
  }
}

</mosaic_0001>

<bundles_post_ra>
// kernel: tpu_custom_call.1
= control target key start
LH: loop header
LB: loop body
LE: loop exit
PB: predicated region body
PF: predicated region fallthrough
CT: control target
= control target key end

     0   :  { %s1623_s0 = inlined_call_operand.hbm [shape: f32[2,1,32,128], index: 0, kind: input, shape index: {}]   ;;  %s1624_s1 = inlined_call_operand.hbm [shape: f32[2,1,64,128], index: 1, kind: input, shape index: {}]   ;;  %s1625_s2 = inlined_call_operand.hbm [shape: bf16[128,512], index: 2, kind: input, shape index: {}]   ;;  %s1626_s3 = inlined_call_operand.hbm [shape: f32[1,512], index: 3, kind: input, shape index: {}]   ;;  %s1627_s4 = inlined_call_operand.hbm [shape: f32[2,32,128], index: 4, kind: output, shape index: {}]  }
   0x1   :  { %1628 = sst [smem:[#allocation17_spill]] %s1623_s0 }
   0x2   :  { %1629 = sst [smem:[#allocation18_spill]] %s1625_s2 }
   0x3   :  { %1630 = sst [smem:[#allocation19_spill]] %s1626_s3 }
   0x4   :  { %9 = vsyncpa [#allocation3], 0 }
   0x5   :  { %11 = vsyncpa [#allocation3 + $0x1], 0 }
   0x6   :  { %12 = vsyncpa [#allocation6], 0 }
   0x7   :  { %14 = vsyncpa [#allocation6 + $0x1], 0 }
   0x8   :  { %15 = vsyncpa [#allocation9], 0 }
   0x9   :  { %16 = vsyncpa [#allocation4], 0 }
   0xa   :  { %18 = vsyncpa [#allocation4 + $0x1], 0  ;;  %s1398_s15 = smov 0   ;;  %s1400_s16 = smov 0  }
   0xb   :  { %s1402_s17 = smov 0   ;;  %s1404_s18 = smov 0  }
   0xc LB: > { %s1419_s19 = sadd.s32 4294967295, %s1363_s18   ;;  %s882_s20 = sadd.s32 4294967294, %s1363_s18   ;;  %s1363_s18 = sphi %s1404_s18, %s1645_s18   ;;  %s1359_s17 = sphi %s1402_s17, %s1644_s17   ;;  %s1355_s16 = sphi %s1400_s16, %s1643_s16   ;;  %s1351_s15 = sphi %s1398_s15, %s1642_s15  }
   0xd   : > { %p44_p0 = scmp.ne.s32.totalorder %s1355_s16, %s1351_s15  ;;  %p45_p1 = scmp.eq.s32.totalorder %s1419_s19, 0 }
   0xe   : > { %p136_p2 = scmp.eq.s32.totalorder %s1419_s19, 1  ;;  %p142_p3 = scmp.eq.s32.totalorder %s882_s20, 1 }
   0xf   : > { %p1428_p4 = por %p45_p1, %p44_p0  ;;  %p883_p5 = scmp.ge.s32.totalorder %s1363_s18, 1 }
  0x10   : > { %p1433_p6 = por %p142_p3, %p44_p0  ;;  %p149_p7 = scmp.lt.s32.totalorder %s1363_s18, 3 }
  0x11   : > { %s1633_s2 = sld [smem:[#allocation18_spill]]  ;;  %s1365_s27 = smov [#allocation7]  }
  0x12   : > { %p1441_p8 = pnand %p883_p5, %p149_p7  ;;  %s162_s28 = sshll.u32 %s1365_s27, 4  ;;  %s163_s28 = int_to_ptr.vmem [resolvable:$true] %s162_s28 }
  0x13   : > { %s1635_s3 = sld [smem:[#allocation19_spill]]  ;;  %s1366_s6 = smov 256  }
  0x14   : > { %p1083_p9 = pneg %p1441_p8  ;;  %s1367_s7 = smov 16  }
  0x15   : > { %s1368_s8 = smov [#allocation8]   ;;  %s1454_s10 = sadd.s32 1, %s1363_s18  }
  0x16   : > { %p1084_p10 = pnand %p1083_p9, %p45_p1  ;;  %s177_s9 = sshll.u32 %s1368_s8, 4  ;;  %s178_s9 = int_to_ptr.vmem [resolvable:$true] %s177_s9 }
  0x17   : > { %s160_s25 = sshll.u32 %s1633_s2, 4  ;;  %s31_s11 = sadd.s32 1, %s1359_s17  ;;  %s161_s25 = int_to_ptr.hbm [resolvable:$true] %s160_s25 }
  0x18   : > { %1086 = dma.hbm_to_vmem [thread:$0]  (!%p1084_p10), %s161_s25, 4096, %s163_s28, [#allocation6], %s1366_s6, %s1366_s6, %s1367_s7  }
  0x19   : > { %s175_s5 = sshll.u32 %s1635_s3, 4  ;;  %s28_s12 = ssub.s32 %s1363_s18, %s1454_s10  ;;  %s176_s5 = int_to_ptr.hbm [resolvable:$true] %s175_s5 }
  0x1a   : > { %1089 = dma.hbm_to_vmem [thread:$0]  (!%p1084_p10), %s176_s5, 64, %s178_s9, [#allocation9]  }
  0x1b   : > { %p38_p12 = scmp.ne.s32.totalorder %s1359_s17, %s1355_s16  ;;  %p29_p13 = scmp.eq.s32.totalorder %s28_s12, 0 }
  0x1c   : > { %p39_p0 = scmp.eq.s32.totalorder %s1363_s18, 0  ;;  %p1103_p5 = scmp.lt.s32.totalorder %s1363_s18, 2 }
  0x1d   : > { %p1464_p3 = por %p136_p2, %p38_p12  ;;  %s1473_s20 = sand.u32 1, %s1359_s17  }
  0x1e   : > { %s1470_s14 = scalar_select %p29_p13, %s1359_s17, %s31_s11  }
  0x1f   : > { %p40_p7 = por %p39_p0, %p38_p12  ;;  %s887_s23 = sshll.u32 %s1473_s20, 5 }
  0x20   : > { %1637 = sst [smem:[#allocation16_spill]] %s1470_s14  ;;  %s1034_s24 = sshll.u32 %s1363_s18, 5 }
  0x21   : > { %s1638_s0 = sld [smem:[#allocation17_spill]]  ;;  %s192_s29 = scalar_lea.vmem [#allocation2], %s887_s23 }
  0x22   : > { %s200_s30 = sshll.u32 %s192_s29, 4  ;;  %p1480_p2 = pnand %p1103_p5, %p40_p7  ;;  %s201_s30 = int_to_ptr.vmem [resolvable:$true] %s200_s30 }
  0x23   : > { %s210_s7 = sand.u32 1, %s1363_s18   ;;  %s189_s8 = scalar_lea.sflag [#allocation3], %s1473_s20 }
  0x24   : > { %p1229_p10 = pneg %p1480_p2 }
  0x27   : > { %s197_s28 = scalar_lea.hbm %s1638_s0, %s1034_s24  ;;  %s1232_s24 = scalar_lea.hbm %s1638_s0, 64 }
  0x28   : > { %s198_s5 = sshll.u32 %s197_s28, 4  ;;  %s199_s5 = int_to_ptr.hbm [resolvable:$true] %s198_s5 }
  0x29   : > { %s1225_s9 = sshra.s32 %s199_s5, 4  ;;  %s1226_s9 = int_to_ptr.hbm [resolvable:$true] %s1225_s9 }
  0x2a   : > { %s1227_s11 = scalar_lea.hbm %s1226_s9, 32  ;;  %p1233_p0 = scmp.lt.s32.totalorder %s1226_s9, %s1638_s0 }
  0x2b   : > { %p1228_p9 = scmp.ne.s32.totalorder %s1226_s9, %s1227_s11  ;;  %p1234_p5 = scmp.lt.s32.totalorder %s1232_s24, %s1227_s11 }
  0x2d   : > { %p1230_p12 = pnand %p1229_p10, %p1228_p9  ;;  %p1235_p7 = por %p1234_p5, %p1233_p0 }
  0x2f   : > { %p1231_p13 = pneg %p1230_p12 }
  0x31   : > { %p1236_p11 = pnand %p1235_p7, %p1231_p13 }
  0x33   : > { %1239 = shalt.err (!%p1236_p11)
}
  0x34   : > { %s1369_s28 = smov 128   ;;  %s1370_s29 = smov 8  }
  0x35   : > { %1093 = dma.hbm_to_vmem [thread:$0]  (!%p1480_p2), %s199_s5, 512, %s201_s30, %s189_s8, %s1369_s28, %s1369_s28, %s1370_s29  }
  0x36   : > { %s890_s2 = sshll.u32 %s1473_s20, 6  ;;  %s1035_s3 = sshll.u32 %s1363_s18, 6 }
  0x37   : > { %s219_s14 = scalar_lea.hbm %s1624_s1, %s1035_s3  ;;  %s214_s25 = scalar_lea.vmem [#allocation5], %s890_s2 }
  0x38   : > { %s222_s9 = sshll.u32 %s214_s25, 4  ;;  %s220_s11 = sshll.u32 %s219_s14, 4  ;;  %s223_s9 = int_to_ptr.vmem [resolvable:$true] %s222_s9  ;;  %s221_s11 = int_to_ptr.hbm [resolvable:$true] %s220_s11 }
  0x39   : > { %s211_s24 = scalar_lea.sflag [#allocation6], %s210_s7  ;;  %s1255_s27 = sshra.s32 %s221_s11, 4  ;;  %s1256_s27 = int_to_ptr.hbm [resolvable:$true] %s1255_s27 }
  0x3a   : > { %s1257_s0 = scalar_lea.hbm %s1256_s27, 64  ;;  %s1262_s5 = scalar_lea.hbm %s1624_s1, 128 }
  0x3b   : > { %p1258_p11 = scmp.ne.s32.totalorder %s1256_s27, %s1257_s0  ;;  %p1263_p13 = scmp.lt.s32.totalorder %s1256_s27, %s1624_s1 }
  0x3c   : > { %p1264_p0 = scmp.lt.s32.totalorder %s1262_s5, %s1257_s0 }
  0x3d   : > { %p1260_p9 = pnand %p1258_p11, %p1229_p10 }
  0x3e   : > { %p1265_p5 = por %p1264_p0, %p1263_p13 }
  0x3f   : > { %p1261_p12 = pneg %p1260_p9 }
  0x41   : > { %p1266_p7 = pnand %p1265_p5, %p1261_p12 }
  0x43   : > { %1269 = shalt.err (!%p1266_p7)
}
  0x44   : > { %1096 = dma.hbm_to_vmem [thread:$0]  (!%p1480_p2), %s221_s11, 1024, %s223_s9, %s211_s24, %s1369_s28, %s1369_s28, %s1370_s29  }
  0x45   : > { %234 = sbr.rel (%p1441_p8) target bundleno = 1027 (0x403), region = 36  ;;  %s1518_s2 = sand.u32 (!%p1441_p8), 1, %s1355_s16  }
  0x46   : > { %s894_s14 = sshll.u32 (!%p1441_p8), %s1518_s2, 5  ;;  %s237_s7 = scalar_lea.sflag (!%p1441_p8), [#allocation3], %s1518_s2 }
  0x47   : > { %s1524_s0 = scalar_lea.vmem (!%p1441_p8), [#allocation2], %s894_s14 }
  0x4a   : > { %1330 = dma.done.wait (%p1428_p4), %s237_s7, 512  }
  0x4b   : > { %1332 = vsyncadd (%p1428_p4), %s237_s7, 4294966784  ;;  %s246_s26 = sand.u32 1, %s1419_s19   ;;  %s895_s6 = sshll.u32 %s1518_s2, 6 }
  0x4c   : > { %s247_s28 = scalar_lea.sflag [#allocation6], %s246_s26  ;;  %s1532_s29 = scalar_lea.vmem [#allocation5], %s895_s6 }
  0x4d   : > { %1334 = dma.done.wait (%p1428_p4), %s247_s28, 1024  }
  0x4e   : > { %1336 = vsyncadd (%p1428_p4), %s247_s28, 4294966272 }
  0x4f   : > { %1338 = dma.done.wait (%p45_p1), [#allocation6], 4096  }
  0x50   : > { %1340 = vsyncadd (%p45_p1), [#allocation6], 4294963200 }
  0x51   : > { %1342 = dma.done.wait (%p45_p1), [#allocation9], 64  }
  0x52   : > { %1344 = vsyncadd (%p45_p1), [#allocation9], 4294967232  ;;  %v989_v0 = vld [vmem:[#allocation7 + $0xe4] sm:$0xf]  ;;  %v1059_v1 = vld [vmem:[#allocation7 + $0xf0] sm:$0xf0] }
  0x53   : > { %v981_v2 = vld [vmem:[#allocation7 + $0xc4] sm:$0xf]  ;;  %v990_v3 = vor.u32 %v1059_v1, %v989_v0  ;;  %v1057_v4 = vld [vmem:[#allocation7 + $0xd0] sm:$0xf0]  ;;  %v350_v25 = vld [vmem:[%s1532_s29 + $0x8] sm:$0xff]  ;;  %vm603_vm0 = vcmask 523264  }
  0x54   : > { %v982_v5 = vor.u32 %v1057_v4, %v981_v2  ;;  %v973_v6 = vld [vmem:[#allocation7 + $0xa4] sm:$0xf]  ;;  %v1055_v7 = vld [vmem:[#allocation7 + $0xb0] sm:$0xf0]  ;;  %v929_v27 = vld [vmem:[#allocation7 + $0xe0] sm:$0xf] }
  0x55   : > { %516 = vmatpush.bf16.msra.mxu1 %v990_v3  ;;  %v974_v8 = vor.u32 %v1055_v7, %v973_v6  ;;  %v965_v9 = vld [vmem:[#allocation7 + $0x84] sm:$0xf]  ;;  %v1053_v10 = vld [vmem:[#allocation7 + $0x90] sm:$0xf0]  ;;  %v1043_v28 = vld [vmem:[#allocation7 + $0xec] sm:$0xf0] }
  0x56   : > { %v966_v11 = vor.u32 %v1053_v10, %v965_v9  ;;  %v957_v12 = vld [vmem:[#allocation7 + $0x64] sm:$0xf]  ;;  %v1051_v13 = vld [vmem:[#allocation7 + $0x70] sm:$0xf0]  ;;  %v925_v29 = vld [vmem:[#allocation7 + $0xc0] sm:$0xf]  ;;  %v930_v30 = vor.u32 %v1043_v28, %v929_v27 }
  0x57   : > { %v958_v14 = vor.u32 %v1051_v13, %v957_v12  ;;  %v949_v15 = vld [vmem:[#allocation7 + $0x44] sm:$0xf]  ;;  %v1049_v16 = vld [vmem:[#allocation7 + $0x50] sm:$0xf0]  ;;  %v1042_v31 = vld [vmem:[#allocation7 + $0xcc] sm:$0xf0] }
  0x58   : > { %v950_v17 = vor.u32 %v1049_v16, %v949_v15  ;;  %v941_v18 = vld [vmem:[#allocation7 + $0x24] sm:$0xf]  ;;  %v1047_v19 = vld [vmem:[#allocation7 + $0x30] sm:$0xf0]  ;;  %412 = vmatpush.bf16.msra.mxu0 %v930_v30  ;;  %v926_v32 = vor.u32 %v1042_v31, %v925_v29  ;;  %v921_v33 = vld [vmem:[#allocation7 + $0xa0] sm:$0xf] }
  0x59   : > { %517 = vmatpush.bf16.msra.mxu1 %v982_v5  ;;  %v942_v20 = vor.u32 %v1047_v19, %v941_v18  ;;  %v933_v21 = vld [vmem:[#allocation7 + $0x4] sm:$0xf]  ;;  %v1045_v22 = vld [vmem:[#allocation7 + $0x10] sm:$0xf0]  ;;  %v1041_v34 = vld [vmem:[#allocation7 + $0xac] sm:$0xf0] }
  0x5a   : > { %v934_v23 = vor.u32 %v1045_v22, %v933_v21  ;;  %v349_v24 = vld [vmem:[%s1532_s29] sm:$0xff]  ;;  %v922_v35 = vor.u32 %v1041_v34, %v921_v33  ;;  %v351_v36 = vld [vmem:[%s1532_s29 + $0x10] sm:$0xff]  ;;  %v352_v37 = vld [vmem:[%s1532_s29 + $0x18] sm:$0xff]  ;;  %s290_s21 = scalar_lea.vmem [#allocation10], %s894_s14  ;;  %s1068_s12 = sshll.u32 %s1419_s19, 5 }
  0x5b   : > { %v1548_v26 = vpack.c.bf16 %v350_v25, %v349_v24  ;;  %v1553_v38 = vpack.c.bf16 %v352_v37, %v351_v36  ;;  %v917_v39 = vld [vmem:[#allocation7 + $0x80] sm:$0xf]  ;;  %v1040_v40 = vld [vmem:[#allocation7 + $0x8c] sm:$0xf0]  ;;  %v354_v51 = vld [vmem:[%s1532_s29 + $0x28] sm:$0xff]  ;;  %s763_s9 = scalar_lea.hbm %s1627_s4, %s1068_s12  ;;  %s764_s11 = sshll.u32 %s290_s21, 4  ;;  %s765_s11 = int_to_ptr.vmem [resolvable:$true] %s764_s11 }
  0x5c   : > { %413 = vmatpush.bf16.msra.mxu0 %v926_v32  ;;  %v913_v41 = vld [vmem:[#allocation7 + $0x60] sm:$0xf]  ;;  %v918_v42 = vor.u32 %v1040_v40, %v917_v39  ;;  %v1039_v43 = vld [vmem:[#allocation7 + $0x6c] sm:$0xf0]  ;;  %v344_v58 = vld [vmem:[%s1524_s0 + $0x8] sm:$0xff]  ;;  %s766_s24 = sshll.u32 %s763_s9, 4  ;;  %s767_s24 = int_to_ptr.hbm [resolvable:$true] %s766_s24 }
  0x5d   : > { %518 = vmatpush.bf16.msra.mxu1 %v974_v8  ;;  %v914_v44 = vor.u32 %v1039_v43, %v913_v41  ;;  %v909_v45 = vld [vmem:[#allocation7 + $0x40] sm:$0xf]  ;;  %v1038_v46 = vld [vmem:[#allocation7 + $0x4c] sm:$0xf0]  ;;  %v356_v61 = vld [vmem:[%s1532_s29 + $0x38] sm:$0xff]  ;;  %s752_s27 = scalar_lea.sflag [#allocation4], %s1518_s2 }
  0x5e   : > { %v910_v47 = vor.u32 %v1038_v46, %v909_v45  ;;  %v905_v48 = vld [vmem:[#allocation7 + $0x20] sm:$0xf]  ;;  %v1037_v49 = vld [vmem:[#allocation7 + $0x2c] sm:$0xf0]  ;;  %v346_v0 = vld [vmem:[%s1524_s0 + $0x18] sm:$0xff]  ;;  %s1299_s20 = sshra.s32 %s767_s24, 4  ;;  %s1300_s20 = int_to_ptr.hbm [resolvable:$true] %s1299_s20 }
  0x5f   : > { %v353_v50 = vld [vmem:[%s1532_s29 + $0x20] sm:$0xff]  ;;  %v906_v52 = vor.u32 %v1037_v49, %v905_v48  ;;  %v1036_v55 = vld [vmem:[#allocation7 + $0xc] sm:$0xf0]  ;;  %v1058_v25 = vld [vmem:[#allocation7 + $0xe8] sm:$0xf]  ;;  %s1301_s30 = scalar_lea.hbm %s1300_s20, 32  ;;  %p1306_p2 = scmp.lt.s32.totalorder %s1300_s20, %s1627_s4 }
  0x60   : > { %414 = vmatpush.bf16.msra.mxu0 %v922_v35  ;;  %v1558_v53 = vpack.c.bf16 %v354_v51, %v353_v50  ;;  %v901_v54 = vld [vmem:[#allocation7] sm:$0xf]  ;;  %v355_v60 = vld [vmem:[%s1532_s29 + $0x30] sm:$0xff]  ;;  %v991_v27 = vld [vmem:[#allocation7 + $0xf4] sm:$0xf0]  ;;  %p1302_p1 = scmp.ne.s32.totalorder %s1300_s20, %s1301_s30  ;;  %s1305_s8 = scalar_lea.hbm %s1627_s4, 64 }
  0x61   : > { %519 = vmatpush.bf16.msra.mxu1 %v966_v11  ;;  %v902_v56 = vor.u32 %v1036_v55, %v901_v54  ;;  %v343_v57 = vld [vmem:[%s1524_s0] sm:$0xff]  ;;  %v1565_v62 = vpack.c.bf16 %v356_v61, %v355_v60  ;;  %v345_v63 = vld [vmem:[%s1524_s0 + $0x10] sm:$0xff]  ;;  %v1056_v28 = vld [vmem:[#allocation7 + $0xc8] sm:$0xf]  ;;  %v994_v29 = vor.u32 %v1058_v25, %v991_v27  ;;  %p1307_p10 = scmp.lt.s32.totalorder %s1305_s8, %s1301_s30 }
  0x62   : > { %v347_v59 = vpack.c.bf16 %v344_v58, %v343_v57  ;;  %v348_v1 = vpack.c.bf16 %v346_v0, %v345_v63  ;;  %v1570_v3 = vld [vmem:[#allocation8 + $0x1] sm:$0x3]  ;;  %v983_v30 = vld [vmem:[#allocation7 + $0xd4] sm:$0xf0]  ;;  %v1054_v33 = vld [vmem:[#allocation7 + $0xa8] sm:$0xf]  ;;  %p1303_p4 = pnand %p1302_p1, %p1464_p3 }
  0x63   : > { %v432_v4 = vperm.slane %v1570_v3, 0  ;;  %545 = vmatpush.bf16.msra.mxu2 %v994_v29  ;;  %v986_v32 = vor.u32 %v1056_v28, %v983_v30  ;;  %v975_v34 = vld [vmem:[#allocation7 + $0xb4] sm:$0xf0]  ;;  %v1147_v35 = vld [vmem:[#allocation8] ss:$0 sm:$0xff]  ;;  %p1308_p11 = por %p1307_p10, %p1306_p2 }
  0x64   : > { %415 = vmatpush.bf16.msra.mxu0 %v918_v42  ;;  %v978_v36 = vor.u32 %v1054_v33, %v975_v34  ;;  %v1052_v37 = vld [vmem:[#allocation7 + $0x88] sm:$0xf]  ;;  %v967_v39 = vld [vmem:[#allocation7 + $0x94] sm:$0xf0]  ;;  %p1304_p8 = pneg %p1303_p4 }
  0x65   : > { %520 = vmatpush.bf16.msra.mxu1 %v958_v14  ;;  %v970_v42 = vor.u32 %v1052_v37, %v967_v39  ;;  %v1050_v43 = vld [vmem:[#allocation7 + $0x68] sm:$0xf]  ;;  %v951_v49 = vld [vmem:[#allocation7 + $0x54] sm:$0xf0] }
  0x66   : > { %v1048_v48 = vld [vmem:[#allocation7 + $0x48] sm:$0xf]  ;;  %v935_v57 = vld [vmem:[#allocation7 + $0x14] sm:$0xf0]  ;;  %p1309_p9 = pnand %p1308_p11, %p1304_p8 }
  0x67   : > { %546 = vmatpush.bf16.msra.mxu2 %v986_v32  ;;  %v954_v50 = vor.u32 %v1048_v48, %v951_v49  ;;  %v1046_v51 = vld [vmem:[#allocation7 + $0x28] sm:$0xf]  ;;  %v1067_v48 = vld [vmem:[#allocation7 + $0xf8] sm:$0xf0]  ;;  %v1023_v49 = vld [vmem:[#allocation7 + $0xcc] sm:$0xf] }
  0x68   : > { %416 = vmatpush.bf16.msra.mxu0 %v914_v44  ;;  %v959_v44 = vld [vmem:[#allocation7 + $0x74] sm:$0xf0] }
  0x69   : > { %521 = vmatpush.bf16.msra.mxu1 %v950_v17 }
  0x6b   : > { %547 = vmatpush.bf16.msra.mxu2 %v978_v36 }
  0x6c   : > { %417 = vmatpush.bf16.msra.mxu0 %v910_v47  ;;  %v962_v47 = vor.u32 %v1050_v43, %v959_v44 }
  0x6d   : > { %522 = vmatpush.bf16.msra.mxu1 %v942_v20 }
  0x6f   : > { %548 = vmatpush.bf16.msra.mxu2 %v970_v42 }
  0x70   : > { %418 = vmatpush.bf16.msra.mxu0 %v906_v52  ;;  %v943_v52 = vld [vmem:[#allocation7 + $0x34] sm:$0xf0] }
  0x71   : > { %523 = vmatpush.bf16.msra.mxu1 %v934_v23  ;;  %v946_v55 = vor.u32 %v1046_v51, %v943_v52  ;;  %v1066_v51 = vld [vmem:[#allocation7 + $0xd8] sm:$0xf0] }
  0x72   : > { %v1024_v52 = vor.u32 %v1066_v51, %v1023_v49 }
  0x73   : > { %549 = vmatpush.bf16.msra.mxu2 %v962_v47  ;;  %v1027_v47 = vld [vmem:[#allocation7 + $0xec] sm:$0xf] }
  0x74   : > { %524 = vmatmul.bf16.vlgmr.msra.gmra.mxu1 %v1548_v26  ;;  %419 = vmatpush.bf16.msra.mxu0 %v902_v56  ;;  %v1044_v56 = vld [vmem:[#allocation7 + $0x8] sm:$0xf] }
  0x75   : > { %v938_v60 = vor.u32 %v1044_v56, %v935_v57  ;;  %v1065_v56 = vld [vmem:[#allocation7 + $0xb8] sm:$0xf0] }
  0x77   : > { %420 = vmatmul.bf16.vlgmr.msra.gmra.mxu0 %v347_v59  ;;  %550 = vmatpush.bf16.msra.mxu2 %v954_v50  ;;  %v1028_v50 = vor.u32 %v1067_v48, %v1027_v47 }
  0x7b   : > { %551 = vmatpush.bf16.msra.mxu2 %v946_v55  ;;  %v1019_v55 = vld [vmem:[#allocation7 + $0xac] sm:$0xf] }
  0x7c   : > { %v1020_v57 = vor.u32 %v1065_v56, %v1019_v55 }
  0x7f   : > { %552 = vmatpush.bf16.msra.mxu2 %v938_v60 }
  0x82   : > { %553 = vmatmul.bf16.vlgmr.msra.gmra.mxu2 %v1548_v26 }
  0x84   : > { %529 = vmatmul.bf16.gmra.mxu1 %v1553_v38 }
  0x87   : > { %425 = vmatmul.bf16.gmra.mxu0 %v348_v1 }
  0x92   : > { %558 = vmatmul.bf16.gmra.mxu2 %v1553_v38 }
  0x94   : > { %534 = vmatmul.bf16.gmra.mxu1 %v1558_v53 }
  0xa2   : > { %563 = vmatmul.bf16.gmra.mxu2 %v1558_v53 }
  0xa4   : > { %539 = vmatmul.bf16.gmra.mxu1 %v1565_v62 }
  0xb2   : > { %568 = vmatmul.bf16.gmra.mxu2 %v1565_v62 }
  0xf1   : > { %v525_v2 = vpop.f32.mrf.mxu1 }
  0xf2   : > { %v526_v6 = vadd.f32 %v525_v2, %v432_v4 }
  0xf4   : > { %v421_v21 = vpop.f32.mrf.mxu0 }
  0xf5   : > { %v422_v40 = vadd.f32 %v1147_v35, %v421_v21 }
  0xf9   : > { %v527_v5 = vpop.f32.mrf.mxu1 }
  0xfa   : > { %v528_v7 = vadd.f32 %v527_v5, %v432_v4 }
  0xfc   : > { %v576_v8 = vpack.c.bf16 %v528_v7, %v526_v6  ;;  %v423_v31 = vpop.f32.mrf.mxu0 }
  0xfd   : > { %v424_v41 = vadd.f32 %v1147_v35, %v423_v31 }
  0xff   : > { %v574_v46 = vpack.c.bf16 %v424_v41, %v422_v40 }
 0x101   : > { %v530_v9 = vpop.f32.mrf.mxu1 }
 0x102   : > { %v531_v23 = vadd.f32 %v530_v9, %v432_v4 }
 0x104   : > { %v426_v45 = vpop.f32.mrf.mxu0 }
 0x105   : > { %v427_v58 = vadd.f32 %v1147_v35, %v426_v45  ;;  %v554_v53 = vpop.f32.mrf.mxu2 }
 0x109   : > { %v532_v10 = vpop.f32.mrf.mxu1 }
 0x10a   : > { %v533_v22 = vadd.f32 %v532_v10, %v432_v4 }
 0x10c   : > { %v577_v24 = vpack.c.bf16 %v533_v22, %v531_v23  ;;  %v428_v54 = vpop.f32.mrf.mxu0 }
 0x10d   : > { %v429_v59 = vadd.f32 %v1147_v35, %v428_v54  ;;  %v556_v6 = vpop.f32.mrf.mxu2 }
 0x10f   : > { %v575_v61 = vpack.c.bf16 %v429_v59, %v427_v58  ;;  %v1015_v58 = vld [vmem:[#allocation7 + $0x8c] sm:$0xf]  ;;  %v1064_v59 = vld [vmem:[#allocation7 + $0x98] sm:$0xf0] }
 0x111   : > { %v535_v11 = vpop.f32.mrf.mxu1 }
 0x112   : > { %v536_v19 = vadd.f32 %v535_v11, %v432_v4 }
 0x115   : > { %v559_v62 = vpop.f32.mrf.mxu2 }
 0x119   : > { %v537_v12 = vpop.f32.mrf.mxu1 }
 0x11a   : > { %v538_v18 = vadd.f32 %v537_v12, %v432_v4 }
 0x11c   : > { %v578_v20 = vpack.c.bf16 %v538_v18, %v536_v19 }
 0x11d   : > { %v561_v7 = vpop.f32.mrf.mxu2 }
 0x121   : > { %v540_v13 = vpop.f32.mrf.mxu1 }
 0x122   : > { %v541_v15 = vadd.f32 %v540_v13, %v432_v4 }
 0x129   : > { %v542_v14 = vpop.f32.mrf.mxu1 }
 0x12a   : > { %v543_v16 = vadd.f32 %v542_v14, %v432_v4  ;;  %v433_v14 = vperm.slane %v1570_v3, 1 }
 0x12c   : > { %v579_v17 = vpack.c.bf16 %v543_v16, %v541_v15  ;;  %v560_v29 = vadd.f32 %v559_v62, %v433_v14  ;;  %v562_v30 = vadd.f32 %v561_v7, %v433_v14  ;;  %v555_v34 = vadd.f32 %v554_v53, %v433_v14  ;;  %v1007_v53 = vld [vmem:[#allocation7 + $0x4c] sm:$0xf] }
 0x12d   : > { %v557_v35 = vadd.f32 %v556_v6, %v433_v14  ;;  %v1062_v6 = vld [vmem:[#allocation7 + $0x58] sm:$0xf0] }
 0x12e   : > { %588 = vmatpush.bf16.xpose.msra.mxu3 %v579_v17  ;;  %v581_v36 = vpack.c.bf16 %v562_v30, %v560_v29  ;;  %v1008_v62 = vor.u32 %v1062_v6, %v1007_v53 }
 0x12f   : > { %v580_v40 = vpack.c.bf16 %v557_v35, %v555_v34 }
 0x136   : > { %589 = vmatpush.bf16.xpose.msra.mxu3 %v578_v20 }
 0x13e   : > { %590 = vmatpush.bf16.xpose.msra.mxu3 %v577_v24 }
 0x146   : > { %591 = vmatpush.bf16.xpose.msra.mxu3 %v576_v8  ;;  %v564_v8 = vpop.f32.mrf.mxu2 }
 0x147   : > { %v565_v22 = vadd.f32 %v564_v8, %v433_v14 }
 0x14d   : > { %592 = vmatmul.bf16.vlgmr.msra.gmra.mxu3 %v574_v46 }
 0x14e   : > { %v566_v9 = vpop.f32.mrf.mxu2  ;;  %728 = vmatpush.bf16.msrb.mxu3 %v1028_v50 }
 0x14f   : > { %v567_v23 = vadd.f32 %v566_v9, %v433_v14 }
 0x151   : > { %v582_v3 = vpack.c.bf16 %v567_v23, %v565_v22 }
 0x152   : > { %729 = vmatpush.bf16.msrb.mxu3 %v1024_v52 }
 0x156   : > { %v569_v13 = vpop.f32.mrf.mxu2  ;;  %730 = vmatpush.bf16.msrb.mxu3 %v1020_v57 }
 0x157   : > { %v570_v20 = vadd.f32 %v569_v13, %v433_v14  ;;  %v1003_v13 = vld [vmem:[#allocation7 + $0x2c] sm:$0xf] }
 0x15d   : > { %597 = vmatmul.bf16.gmra.mxu3 %v575_v61 }
 0x15e   : > { %v571_v21 = vpop.f32.mrf.mxu2 }
 0x15f   : > { %v572_v24 = vadd.f32 %v571_v21, %v433_v14  ;;  %v1061_v14 = vld [vmem:[#allocation7 + $0x38] sm:$0xf0] }
 0x161   : > { %v583_v27 = vpack.c.bf16 %v572_v24, %v570_v20 }
 0x163   : > { %660 = vmatpush.bf16.msrb.mxu0 %v583_v27 }
 0x167   : > { %661 = vmatpush.bf16.msrb.mxu0 %v582_v3 }
 0x16b   : > { %662 = vmatpush.bf16.msrb.mxu0 %v581_v36 }
 0x16f   : > { %663 = vmatpush.bf16.msrb.mxu0 %v580_v40 }
 0x1d0   : > { %v593_v63 = vpop.f32.mrf.mxu3 }
 0x1d1   : > { %v604_v0 = vsel %vm603_vm0, %v593_v63, -inf }
 0x1d2   : > { %605 = vmax.xlane.f32.xlu0 %v604_v0 }
 0x1d8   : > { %v595_v1 = vpop.f32.mrf.mxu3 }
 0x1d9   : > { %v607_v2 = vsel %vm603_vm0, %v595_v1, -inf }
 0x1da   : > { %608 = vmax.xlane.f32.xlu0 %v607_v2  ;;  %v1011_v2 = vld [vmem:[#allocation7 + $0x6c] sm:$0xf] }
 0x1e0   : > { %v598_v4 = vpop.f32.mrf.mxu3 }
 0x1e1   : > { %v610_v5 = vsel %vm603_vm0, %v598_v4, -inf }
 0x1e2   : > { %611 = vmax.xlane.f32.xlu1 %v610_v5 }
 0x1e8   : > { %v600_v26 = vpop.f32.mrf.mxu3 }
 0x1e9   : > { %v613_v38 = vsel %vm603_vm0, %v600_v26, -inf }
 0x1ea   : > { %614 = vmax.xlane.f32.xlu1 %v613_v38 }
 0x245   : > { %v606_v10 = vpop.xlane.xlu0 %605 }
 0x246   : > { %v616_v11 = vsub.f32 %v593_v63, %v606_v10  ;;  %v1016_v63 = vor.u32 %v1064_v59, %v1015_v58 }
 0x248   : > { %v620_v12 = vmul.f32 1.442695, %v616_v11  ;;  %731 = vmatpush.bf16.msrb.mxu3 %v1016_v63 }
 0x24a   : > { %1149 = vpow2.f32 %v620_v12 }
 0x24d   : > { %v609_v15 = vpop.xlane.xlu0 %608 }
 0x24e   : > { %v617_v16 = vsub.f32 %v595_v1, %v609_v15  ;;  %v999_v15 = vld [vmem:[#allocation7 + $0xc] sm:$0xf] }
 0x250   : > { %v1150_v17 = vpop.eup %1149  ;;  %v622_v18 = vmul.f32 1.442695, %v617_v16  ;;  %v1004_v16 = vor.u32 %v1061_v14, %v1003_v13 }
 0x251   : > { %v628_v19 = vsel %vm603_vm0, %v1150_v17, 0.0 }
 0x252   : > { %1151 = vpow2.f32 %v622_v18  ;;  %629 = vadd.xlane.f32.xlu2 %v628_v19 }
 0x255   : > { %v612_v25 = vpop.xlane.xlu1 %611 }
 0x256   : > { %v618_v28 = vsub.f32 %v598_v4, %v612_v25  ;;  %v1063_v4 = vld [vmem:[#allocation7 + $0x78] sm:$0xf0]  ;;  %v1148_v25 = vld [vmem:[#allocation8 + $0x3] ss:$0 sm:$0xff] }
 0x258   : > { %v1152_v31 = vpop.eup %1151  ;;  %v624_v32 = vmul.f32 1.442695, %v618_v28 }
 0x259   : > { %v631_v33 = vsel %vm603_vm0, %v1152_v31, 0.0 }
 0x25a   : > { %1153 = vpow2.f32 %v624_v32  ;;  %632 = vadd.xlane.f32.xlu2 %v631_v33 }
 0x25d   : > { %v615_v37 = vpop.xlane.xlu1 %614 }
 0x25e   : > { %v619_v39 = vsub.f32 %v600_v26, %v615_v37  ;;  %v1012_v26 = vor.u32 %v1063_v4, %v1011_v2 }
 0x260   : > { %v1154_v41 = vpop.eup %1153  ;;  %v626_v42 = vmul.f32 1.442695, %v619_v39  ;;  %732 = vmatpush.bf16.msrb.mxu3 %v1012_v26 }
 0x261   : > { %v634_v43 = vsel %vm603_vm0, %v1154_v41, 0.0 }
 0x262   : > { %1155 = vpow2.f32 %v626_v42  ;;  %635 = vadd.xlane.f32.xlu0 %v634_v43 }
 0x264   : > { %733 = vmatpush.bf16.msrb.mxu3 %v1008_v62 }
 0x268   : > { %v1156_v44 = vpop.eup %1155  ;;  %734 = vmatpush.bf16.msrb.mxu3 %v1004_v16 }
 0x269   : > { %v637_v45 = vsel %vm603_vm0, %v1156_v44, 0.0 }
 0x26a   : > { %638 = vadd.xlane.f32.xlu1 %v637_v45 }
 0x2c5   : > { %v630_v46 = vpop.xlane.xlu2 %629 }
 0x2c6   : > { %1157 = vrcp.f32 %v630_v46 }
 0x2cc   : > { %v1158_v60 = vpop.eup %1157 }
 0x2cd   : > { %v633_v54 = vpop.xlane.xlu2 %632  ;;  %v644_v0 = vmul.f32 %v1158_v60, %v1150_v17  ;;  %v1060_v17 = vld [vmem:[#allocation7 + $0x18] sm:$0xf0] }
 0x2ce   : > { %1159 = vrcp.f32 %v633_v54  ;;  %v1000_v18 = vor.u32 %v1060_v17, %v999_v15 }
 0x2d0   : > { %735 = vmatpush.bf16.msrb.mxu3 %v1000_v18 }
 0x2d4   : > { %v1160_v61 = vpop.eup %1159 }
 0x2d5   : > { %v645_v1 = vmul.f32 %v1160_v61, %v1152_v31  ;;  %v636_v38 = vpop.xlane.xlu0 %635 }
 0x2d6   : > { %1161 = vrcp.f32 %v636_v38 }
 0x2d7   : > { %v648_v5 = vpack.c.bf16 %v645_v1, %v644_v0 }
 0x2d9   : > { %995 = vmatmul.msk.bf16.vlgmr.msrb.gmra.mxu0 %vm603_vm0, %v648_v5 }
 0x2dc   : > { %v1162_v8 = vpop.eup %1161 }
 0x2dd   : > { %v639_v7 = vpop.xlane.xlu1 %638  ;;  %v646_v10 = vmul.f32 %v1162_v8, %v1154_v41 }
 0x2de   : > { %1163 = vrcp.f32 %v639_v7 }
 0x2e4   : > { %v1164_v9 = vpop.eup %1163 }
 0x2e5   : > { %v647_v11 = vmul.f32 %v1164_v9, %v1156_v44 }
 0x2e7   : > { %v649_v12 = vpack.c.bf16 %v647_v11, %v646_v10 }
 0x2e9   : > { %996 = vmatmul.msk.bf16.gmra.mxu0 %vm603_vm0, %v649_v12 }
 0x356   : > { %v665_v19 = vpop.f32.mrf.mxu0 }
 0x35e   : > { %v667_v20 = vpop.f32.mrf.mxu0 }
 0x35f   : > { %v675_v21 = vpack.c.bf16 %v667_v20, %v665_v19 }
 0x361   : > { %736 = vmatmul.bf16.vlgmr.msrb.gmra.mxu3 %v675_v21 }
 0x366   : > { %v670_v22 = vpop.f32.mrf.mxu0 }
 0x36e   : > { %v672_v23 = vpop.f32.mrf.mxu0 }
 0x36f   : > { %v676_v24 = vpack.c.bf16 %v672_v23, %v670_v22 }
 0x371   : > { %741 = vmatmul.bf16.gmra.mxu3 %v676_v24 }
 0x3e4   : > { %v737_v27 = vpop.f32.mrf.mxu3 }
 0x3e5   : > { %v738_v28 = vadd.f32 %v1148_v25, %v737_v27 }
 0x3e7   : > { %747 = vst [vmem:[%s290_s21] sm:$0xff] %v738_v28 }
 0x3ec   : > { %v739_v29 = vpop.f32.mrf.mxu3 }
 0x3ed   : > { %v740_v30 = vadd.f32 %v1148_v25, %v739_v29 }
 0x3ef   : > { %748 = vst [vmem:[%s290_s21 + $0x8] sm:$0xff] %v740_v30 }
 0x3f4   : > { %v742_v3 = vpop.f32.mrf.mxu3 }
 0x3f5   : > { %v743_v31 = vadd.f32 %v1148_v25, %v742_v3 }
 0x3f7   : > { %749 = vst [vmem:[%s290_s21 + $0x10] sm:$0xff] %v743_v31 }
 0x3fc   : > { %v744_v32 = vpop.f32.mrf.mxu3 }
 0x3fd   : > { %v745_v33 = vadd.f32 %v1148_v25, %v744_v32 }
 0x3ff   : > { %750 = vst [vmem:[%s290_s21 + $0x18] sm:$0xff] %v745_v33 }
 0x400   : > { %1312 = shalt.err (!%p1309_p9)
}
 0x401   : > { %s1371_s2 = smov 128   ;;  %s1372_s7 = smov 8  }
 0x402   : > { %1081 = dma.vmem_to_hbm [thread:$0]  (%p1464_p3), %s765_s11, 512, %s767_s24, %s752_s27, %s1371_s2, %s1371_s2, %s1372_s7  }
 0x403 PF: > { %s781_s0 = sand.u32 1, %s1351_s15   ;;  %p1640_p12 = scmp.ge.s32.totalorder %s1363_s18, 2 }
 0x404   : > { %s782_s26 = scalar_lea.sflag [#allocation4], %s781_s0 }
 0x405   : > { %p1098_p13 = pnand %p1640_p12, %p1433_p6 }
 0x407   : > { %p1099_p0 = pneg %p1098_p13 }
 0x409   : > { %1346 = dma.done.wait (%p1099_p0), %s782_s26, 512  }
 0x40a   : > { %1348 = vsyncadd (%p1099_p0), %s782_s26, 4294966784  ;;  %s1641_s6 = sld [smem:[#allocation16_spill]]  ;;  %p21_p5 = scmp.ge.s32.totalorder %s1454_s10, 4  }
 0x40b   : > { %s1642_s15 = smov %s1355_s16  ;;  %s1643_s16 = smov %s1359_s17 }
 0x40c   : > { %s1645_s18 = smov %s1454_s10  ;;  %23 = sbr.rel (!%p21_p5) target bundleno = 12 (0xc), region = 102 }
 0x410   : > { %s1644_s17 = smov %s1641_s6 }
 0x411   :  { %788 = vsyncpa [#allocation3], 1 }
 0x412   :  { %790 = vsyncpa [#allocation3 + $0x1], 1 }
 0x413   :  { %791 = vsyncpa [#allocation6], 1 }
 0x414   :  { %793 = vsyncpa [#allocation6 + $0x1], 1 }
 0x415   :  { %794 = vsyncpa [#allocation9], 1 }
 0x416   :  { %795 = vsyncpa [#allocation4], 1 }
 0x417   :  { %797 = vsyncpa [#allocation4 + $0x1], 1 }

</bundles_post_ra>
